<compile_context>
chip_gen: v5e
topology: v5e:2x2
jax: 0.10.0
libtpu: 0.0.40
codegen_flags: <defaults>
</compile_context>

<pallas_src>
import functools

import numpy as np
import jax
import jax.numpy as jnp
from jax.experimental import pallas as pl
from jax.experimental.pallas import tpu as pltpu

_CB = 128  # channel super-block: one lane-width of output channels


def _round_up(x, m):
    return (x + m - 1) // m * m


# ----------------------------------------------------------------------------
# Pallas kernels
# ----------------------------------------------------------------------------

def _mm_epilogue(acc_ref, bias_ref, res_ref, o_ref, relu):
    r = acc_ref[...] + bias_ref[...]
    if res_ref is not None:
        r = r + res_ref[...].astype(jnp.float32)
    if relu:
        r = jnp.maximum(r, 0.0)
    o_ref[...] = r.astype(o_ref.dtype)


def _mm_body(a_ref, b_ref, bias_ref, res_ref, o_ref, acc_ref, relu):
    k = pl.program_id(2)

    @pl.when(k == 0)
    def _():
        acc_ref[...] = jnp.zeros_like(acc_ref)

    acc_ref[...] += jnp.dot(a_ref[...], b_ref[...],
                            preferred_element_type=jnp.float32)

    @pl.when(k == pl.num_programs(2) - 1)
    def _():
        _mm_epilogue(acc_ref, bias_ref, res_ref, o_ref, relu)


def _mm_kernel(a_ref, b_ref, bias_ref, o_ref, acc_ref, *, relu):
    """o = act(a @ b + bias); bf16 operands, f32 accumulation."""
    _mm_body(a_ref, b_ref, bias_ref, None, o_ref, acc_ref, relu)


def _mm_res_kernel(a_ref, b_ref, bias_ref, res_ref, o_ref, acc_ref, *, relu):
    """o = act(a @ b + bias + residual) — fused bottleneck tail."""
    _mm_body(a_ref, b_ref, bias_ref, res_ref, o_ref, acc_ref, relu)


def _grouped_mm_kernel(a_ref, b_ref, bias_ref, o_ref):
    """Group-aware 3x3 grouped-conv tile: each 128-wide output-channel tile
    contracts only over its own 9*128 K slice (zero blocks of the grouped
    weight are never stored, DMA'd or multiplied).  ReLU always applied."""
    r = jnp.dot(a_ref[...], b_ref[...], preferred_element_type=jnp.float32)
    r = r + bias_ref[...]
    r = jnp.maximum(r, 0.0)
    o_ref[...] = r.astype(o_ref.dtype)


def _max9_kernel(*refs):
    """Pairwise max of 9 shifted window slices (3x3 max pool)."""
    o_ref = refs[-1]
    m = refs[0][...]
    for r in refs[1:-1]:
        m = jnp.maximum(m, r[...])
    o_ref[...] = m


def _mean_kernel(x_ref, o_ref):
    """x: (B, S, TC) -> o: (B, TC) global average pool (f32 accumulation)."""
    o_ref[...] = jnp.mean(x_ref[...].astype(jnp.float32), axis=1)


# ----------------------------------------------------------------------------
# Pallas wrappers (cached per shape signature)
# ----------------------------------------------------------------------------

@functools.lru_cache(maxsize=None)
def _build_matmul(Mp, Kp, Np, TM, TK, TN, relu, has_res, out_dtype):
    kernel = functools.partial(
        _mm_res_kernel if has_res else _mm_kernel, relu=relu)
    in_specs = [
        pl.BlockSpec((TM, TK), lambda i, j, k: (i, k)),
        pl.BlockSpec((TK, TN), lambda i, j, k: (k, j)),
        pl.BlockSpec((1, TN), lambda i, j, k: (0, j)),
    ]
    if has_res:
        in_specs.append(pl.BlockSpec((TM, TN), lambda i, j, k: (i, j)))
    call = pl.pallas_call(
        kernel,
        out_shape=jax.ShapeDtypeStruct((Mp, Np), out_dtype),
        grid_spec=pltpu.PrefetchScalarGridSpec(
            num_scalar_prefetch=0,
            grid=(Mp // TM, Np // TN, Kp // TK),
            in_specs=in_specs,
            out_specs=pl.BlockSpec((TM, TN), lambda i, j, k: (i, j)),
            scratch_shapes=[pltpu.VMEM((TM, TN), jnp.float32)],
        ),
        compiler_params=pltpu.CompilerParams(
            dimension_semantics=("parallel", "parallel", "arbitrary")),
    )
    return jax.jit(call)


def matmul_bias_act(a, b, bias, relu, residual=None, out_dtype=jnp.bfloat16):
    """act(a @ b + bias [+ residual]); bf16 MXU operands, f32 accumulation."""
    M, K = a.shape
    _, N = b.shape
    a = a.astype(jnp.bfloat16)
    b = b.astype(jnp.bfloat16)

    Mp = _round_up(M, 8)
    TM = 256 if Mp >= 256 else Mp
    Mp = _round_up(Mp, TM)
    Kp = _round_up(K, 128)
    TK = 512 if Kp % 512 == 0 else (256 if Kp % 256 == 0 else 128)
    Np = _round_up(N, 128)
    TN = 256 if Np % 256 == 0 else 128

    a_p = jnp.pad(a, ((0, Mp - M), (0, Kp - K)))
    b_p = jnp.pad(b, ((0, Kp - K), (0, Np - N)))
    bias_p = jnp.pad(bias.astype(jnp.float32), (0, Np - N)).reshape(1, Np)
    args = [a_p, b_p, bias_p]
    if residual is not None:
        args.append(jnp.pad(residual.astype(jnp.bfloat16),
                            ((0, Mp - M), (0, Np - N))))

    out = _build_matmul(Mp, Kp, Np, TM, TK, TN, bool(relu),
                        residual is not None, out_dtype)(*args)
    if Mp != M or Np != N:
        out = out[:M, :N]
    return out


@functools.lru_cache(maxsize=None)
def _build_grouped_matmul(Mp, Nt, TM):
    KG = 9 * _CB
    call = pl.pallas_call(
        _grouped_mm_kernel,
        out_shape=jax.ShapeDtypeStruct((Mp, Nt * _CB), jnp.bfloat16),
        grid_spec=pltpu.PrefetchScalarGridSpec(
            num_scalar_prefetch=0,
            grid=(Mp // TM, Nt),
            in_specs=[
                # A K-block index depends on the N tile (group-aware skipping).
                pl.BlockSpec((TM, KG), lambda i, j: (i, j)),
                pl.BlockSpec((KG, _CB), lambda i, j: (j, 0)),
                pl.BlockSpec((1, _CB), lambda i, j: (0, j)),
            ],
            out_specs=pl.BlockSpec((TM, _CB), lambda i, j: (i, j)),
        ),
        compiler_params=pltpu.CompilerParams(
            dimension_semantics=("parallel", "parallel")),
    )
    return jax.jit(call)


@functools.lru_cache(maxsize=None)
def _build_max9(Mp, C, TM):
    return jax.jit(pl.pallas_call(
        _max9_kernel,
        out_shape=jax.ShapeDtypeStruct((Mp, C), jnp.bfloat16),
        grid_spec=pltpu.PrefetchScalarGridSpec(
            num_scalar_prefetch=0,
            grid=(Mp // TM,),
            in_specs=[pl.BlockSpec((TM, C), lambda i: (i, 0))
                      for _ in range(9)],
            out_specs=pl.BlockSpec((TM, C), lambda i: (i, 0)),
        ),
        compiler_params=pltpu.CompilerParams(
            dimension_semantics=("parallel",)),
    ))


@functools.lru_cache(maxsize=None)
def _build_avgpool(B, S, C, TC):
    return jax.jit(pl.pallas_call(
        _mean_kernel,
        out_shape=jax.ShapeDtypeStruct((B, C), jnp.float32),
        grid_spec=pltpu.PrefetchScalarGridSpec(
            num_scalar_prefetch=0,
            grid=(C // TC,),
            in_specs=[pl.BlockSpec((B, S, TC), lambda j: (0, 0, j))],
            out_specs=pl.BlockSpec((B, TC), lambda j: (0, j)),
        ),
        compiler_params=pltpu.CompilerParams(
            dimension_semantics=("parallel",)),
    ))


# ----------------------------------------------------------------------------
# Conv / pool glue
# ----------------------------------------------------------------------------

def im2col(x, KH, KW, stride, pad):
    """Generic im2col, K ordering (kh, kw, c_in) — used for the 7x7 stem."""
    B, H, W, C = x.shape
    Ho = (H + 2 * pad - KH) // stride + 1
    Wo = (W + 2 * pad - KW) // stride + 1
    xp = jnp.pad(x, ((0, 0), (pad, pad), (pad, pad), (0, 0)))
    cols = []
    for kh in range(KH):
        for kw in range(KW):
            cols.append(xp[:, kh::stride, kw::stride, :][:, :Ho, :Wo, :])
    return jnp.concatenate(cols, axis=-1), Ho, Wo


def im2col_grouped(x, stride):
    """3x3 / pad=1 im2col with K ordered (128-chan block, kh, kw, c_in_block)
    so each 128-wide output-channel tile contracts one contiguous 9*128 slice."""
    B, H, W, C = x.shape
    Ho = (H + 2 - 3) // stride + 1
    Wo = (W + 2 - 3) // stride + 1
    xp = jnp.pad(x, ((0, 0), (1, 1), (1, 1), (0, 0)))
    cols = []
    for cb in range(C // _CB):
        xb = xp[..., cb * _CB:(cb + 1) * _CB]
        for kh in range(3):
            for kw in range(3):
                cols.append(xb[:, kh::stride, kw::stride, :][:, :Ho, :Wo, :])
    patches = jnp.concatenate(cols, axis=-1)
    return patches.reshape(B * Ho * Wo, -1), Ho, Wo


def conv_stem(x, p):
    B = x.shape[0]
    patches, Ho, Wo = im2col(x, p['kh'], p['kw'], p['stride'], p['pad'])
    K = patches.shape[-1]
    out = matmul_bias_act(patches.reshape(B * Ho * Wo, K), p['w2d'], p['b'],
                          relu=True)
    return out.reshape(B, Ho, Wo, -1)


def conv1x1(x, p, relu, residual=None, out_dtype=jnp.bfloat16):
    """1x1 conv + folded BN (+ fused residual add) + optional ReLU (no im2col)."""
    s = p['stride']
    if s != 1:
        x = x[:, ::s, ::s, :]
    B, Ho, Wo, C = x.shape
    a = x.reshape(B * Ho * Wo, C)
    res = residual.reshape(B * Ho * Wo, -1) if residual is not None else None
    out = matmul_bias_act(a, p['w2d'], p['b'], relu=relu, residual=res,
                          out_dtype=out_dtype)
    return out.reshape(B, Ho, Wo, -1)


def grouped_conv3x3(x, p):
    """3x3 grouped (32-group) conv + folded BN + ReLU, group-aware tiling."""
    B, H, W, C = x.shape
    patches, Ho, Wo = im2col_grouped(x, p['stride'])
    M = B * Ho * Wo
    Mp = _round_up(M, 8)
    TM = 256 if Mp >= 256 else Mp
    Mp = _round_up(Mp, TM)
    if Mp != M:
        patches = jnp.pad(patches, ((0, Mp - M), (0, 0)))
    bias = p['b'].astype(jnp.float32).reshape(1, -1)
    out = _build_grouped_matmul(Mp, p['nt'], TM)(patches, p['w2d'], bias)
    if Mp != M:
        out = out[:M]
    return out.reshape(B, Ho, Wo, C)


def maxpool_3x3_s2_p1(x):
    """NHWC 3x3 stride-2 pad-1 max pool via pairwise maxima of 9 shifted slices."""
    B, H, W, C = x.shape
    Ho = (H - 1) // 2 + 1
    Wo = (W - 1) // 2 + 1
    xp = jnp.pad(x, ((0, 0), (1, 1), (1, 1), (0, 0)), constant_values=-np.inf)
    wins = []
    for kh in range(3):
        for kw in range(3):
            wins.append(xp[:, kh::2, kw::2, :][:, :Ho, :Wo, :]
                        .reshape(B * Ho * Wo, C))
    M = B * Ho * Wo
    Mp = _round_up(M, 8)
    TM = 256 if Mp >= 256 else Mp
    Mp = _round_up(Mp, TM)
    if Mp != M:
        wins = [jnp.pad(w, ((0, Mp - M), (0, 0))) for w in wins]
    out = _build_max9(Mp, C, TM)(*wins)
    if Mp != M:
        out = out[:M]
    return out.reshape(B, Ho, Wo, C)


def global_avgpool(x):
    """NHWC -> (B, C) in f32 (AdaptiveAvgPool2d(1) + flatten)."""
    B, H, W, C = x.shape
    TC = 512 if C % 512 == 0 else 128
    return _build_avgpool(B, H * W, C, TC)(x.reshape(B, H * W, C))


# ----------------------------------------------------------------------------
# Parameter construction (deterministic synthetic init, BN folded, bf16 weights)
# ----------------------------------------------------------------------------

class KeyGen:
    def __init__(self, key):
        self._key = key
        self._i = 0

    def __call__(self):
        self._i += 1
        return jax.random.fold_in(self._key, self._i)


def _bn_fold(kg, c_out):
    gamma = 1.0 + 0.1 * jax.random.normal(kg(), (c_out,), jnp.float32)
    beta = 0.1 * jax.random.normal(kg(), (c_out,), jnp.float32)
    mean = 0.02 * jax.random.normal(kg(), (c_out,), jnp.float32)
    var = 1.0 + 0.1 * jnp.abs(jax.random.normal(kg(), (c_out,), jnp.float32))
    scale = gamma / jnp.sqrt(var + 1e-5)
    bias = beta - mean * scale
    return scale, bias


def make_conv_bn(kg, c_in, c_out, kh, kw, stride, pad, weight=None):
    """Plain (groups=1) Conv2d + folded BN; weight stored bf16, K=(kh,kw,c_in)."""
    if weight is None:
        weight = 0.05 * jax.random.normal(
            kg(), (c_out, c_in, kh, kw), jnp.float32)
    scale, bias = _bn_fold(kg, c_out)
    wt = jnp.transpose(weight, (2, 3, 1, 0)) * scale     # (kh, kw, c_in, c_out)
    w2d = wt.reshape(kh * kw * c_in, c_out).astype(jnp.bfloat16)
    return {'w2d': w2d, 'b': bias, 'kh': kh, 'kw': kw,
            'stride': stride, 'pad': pad}


def make_grouped_conv_bn(kg, width, stride, groups=32):
    """Grouped 3x3 conv + folded BN, stored compactly per 128-out-channel tile:
    w2d[(j*9 + kh*3 + kw)*128 + ci, co] for output channel j*128+co."""
    cig = width // groups                                # == out-channels/group
    weight = 0.05 * jax.random.normal(kg(), (width, cig, 3, 3), jnp.float32)
    scale, bias = _bn_fold(kg, width)
    w_np = np.asarray(weight, np.float32)
    s_np = np.asarray(scale, np.float32)
    nt = width // _CB
    wc = np.zeros((nt, 9 * _CB, _CB), np.float32)
    for g in range(groups):
        oc0 = g * cig
        j = oc0 // _CB
        off = oc0 - j * _CB                  # same offset for in & out channels
        blk = np.transpose(w_np[oc0:oc0 + cig], (2, 3, 1, 0))  # (3,3,ci,co)
        blk = blk * s_np[oc0:oc0 + cig]
        for kh in range(3):
            for kw in range(3):
                base = (kh * 3 + kw) * _CB + off
                wc[j, base:base + cig, off:off + cig] = blk[kh, kw]
    w2d = jnp.asarray(wc.reshape(nt * 9 * _CB, _CB), dtype=jnp.bfloat16)
    return {'w2d': w2d, 'b': bias, 'stride': stride, 'nt': nt}


def build_resnext50_32x4d_params(seed=0, output_size=6):
    kg = KeyGen(jax.random.PRNGKey(seed))
    groups, base_width, expansion = 32, 4, 4
    params = {}

    # Stem: original 3-channel 7x7 conv averaged over input channels -> 1 chan
    w3 = 0.05 * jax.random.normal(kg(), (64, 3, 7, 7), jnp.float32)
    w1 = jnp.mean(w3, axis=1, keepdims=True)
    params['stem'] = make_conv_bn(kg, 1, 64, 7, 7, stride=2, pad=3, weight=w1)

    cfg = [(64, 3, 1), (128, 4, 2), (256, 6, 2), (512, 3, 2)]
    inplanes = 64
    layers = []
    for planes, nblocks, stride in cfg:
        width = planes * base_width // 64 * groups
        blocks = []
        for bi in range(nblocks):
            s = stride if bi == 0 else 1
            blk = {
                'conv1': make_conv_bn(kg, inplanes, width, 1, 1, 1, 0),
                'conv2': make_grouped_conv_bn(kg, width, s, groups=groups),
                'conv3': make_conv_bn(kg, width, planes * expansion, 1, 1, 1, 0),
            }
            if bi == 0 and (s != 1 or inplanes != planes * expansion):
                blk['downsample'] = make_conv_bn(
                    kg, inplanes, planes * expansion, 1, 1, s, 0)
            blocks.append(blk)
            inplanes = planes * expansion
        layers.append(blocks)
    params['layers'] = layers

    # classifier = nn.Linear(2048, output_size); model.fc = Identity
    params['fc_w'] = 0.02 * jax.random.normal(
        kg(), (inplanes, output_size), jnp.float32)
    params['fc_b'] = 0.01 * jax.random.normal(kg(), (output_size,), jnp.float32)
    return params


# ----------------------------------------------------------------------------
# Forward pass
# ----------------------------------------------------------------------------

def resnext_forward(params, x_nchw):
    # NCHW -> NHWC, bf16 activations throughout the trunk
    x = jnp.transpose(x_nchw, (0, 2, 3, 1)).astype(jnp.bfloat16)
    x = conv_stem(x, params['stem'])
    x = maxpool_3x3_s2_p1(x)
    for blocks in params['layers']:
        for blk in blocks:
            if 'downsample' in blk:
                identity = conv1x1(x, blk['downsample'], relu=False)
            else:
                identity = x
            out = conv1x1(x, blk['conv1'], relu=True)
            out = grouped_conv3x3(out, blk['conv2'])
            # conv3 + BN + residual add + ReLU fused into one matmul epilogue
            x = conv1x1(out, blk['conv3'], relu=True, residual=identity)
    dense_logits = global_avgpool(x)                  # (B, 2048) f32, fc=Identity
    class_logits = matmul_bias_act(dense_logits, params['fc_w'],
                                   params['fc_b'], relu=False,
                                   out_dtype=jnp.float32)  # (B, 6)
    return dense_logits, class_logits


# ----------------------------------------------------------------------------

if __name__ == "__main__":
    key = jax.random.PRNGKey(0)
    # Modified conv1 takes 1 input channel; 64x64 spatial keeps all stages
    # non-degenerate (final feature map 2x2 before global average pool).
    x = jax.random.normal(key, (2, 1, 64, 64), jnp.float32)  # NCHW

    params = build_resnext50_32x4d_params(seed=0, output_size=6)
    dense, logits = resnext_forward(params, x)
    jax.block_until_ready(dense)
    jax.block_until_ready(logits)

    assert dense.shape == (2, 2048) and dense.dtype == jnp.float32
    assert logits.shape == (2, 6) and logits.dtype == jnp.float32
    assert bool(jnp.all(jnp.isfinite(dense))) and bool(jnp.all(jnp.isfinite(logits)))
    print("KERNEL_OK")
</pallas_src>

<mosaic_0001>
module attributes {stable_mosaic.version = 11 : i64} {
  func.func @_mm_kernel(%arg0: i32, %arg1: i32, %arg2: i32, %arg3: memref<256x128xbf16, #tpu.memory_space<vmem>>, %arg4: memref<128x128xbf16, #tpu.memory_space<vmem>>, %arg5: memref<1x128xf32, #tpu.memory_space<vmem>>, %arg6: memref<256x128xbf16, #tpu.memory_space<vmem>>, %arg7: memref<256x128xf32, #tpu.memory_space<vmem>>) attributes {dimension_semantics = [#tpu.dimension_semantics<parallel>, #tpu.dimension_semantics<parallel>, #tpu.dimension_semantics<arbitrary>], iteration_bounds = array<i64: 8, 1, 1>, scalar_prefetch = 0 : i64, scratch_operands = 1 : i64, tpu.core_type = #tpu.core_type<tc>, window_params = [{transform_indices = @transform_0, window_bounds = array<i64: 256, 128>}, {transform_indices = @transform_1, window_bounds = array<i64: 128, 128>}, {transform_indices = @transform_2, window_bounds = array<i64: 1, 128>}, {transform_indices = @transform_3, window_bounds = array<i64: 256, 128>}]} {
    %c0_i32 = arith.constant 0 : i32
    %0 = arith.cmpi eq, %arg2, %c0_i32 : i32
    %1 = arith.extui %0 : i1 to i32
    %c0_i32_0 = arith.constant 0 : i32
    %2 = arith.cmpi ne, %1, %c0_i32_0 : i32
    scf.if %2 {
      %cst_10 = arith.constant 0.000000e+00 : f32
      %12 = vector.broadcast %cst_10 : f32 to vector<256x128xf32>
      %c0_11 = arith.constant 0 : index
      %c0_12 = arith.constant 0 : index
      %13 = vector.load %arg7[%c0_11, %c0_12] : memref<256x128xf32, #tpu.memory_space<vmem>>, vector<256x128xf32>
      tpu.vector_store %arg7[%c0_11, %c0_12], %12 {strides = array<i32>} : memref<256x128xf32, #tpu.memory_space<vmem>>, vector<256x128xf32>,
    } else {
    }
    %c0 = arith.constant 0 : index
    %c0_1 = arith.constant 0 : index
    %3 = vector.load %arg7[%c0, %c0_1] : memref<256x128xf32, #tpu.memory_space<vmem>>, vector<256x128xf32>
    %c0_2 = arith.constant 0 : index
    %c0_3 = arith.constant 0 : index
    %4 = vector.load %arg3[%c0_2, %c0_3] : memref<256x128xbf16, #tpu.memory_space<vmem>>, vector<256x128xbf16>
    %c0_4 = arith.constant 0 : index
    %c0_5 = arith.constant 0 : index
    %5 = vector.load %arg4[%c0_4, %c0_5] : memref<128x128xbf16, #tpu.memory_space<vmem>>, vector<128x128xbf16>
    %cst = arith.constant dense<0.000000e+00> : vector<256x128xf32>
    %6 = tpu.matmul %4, %5, %cst {dimension_numbers = #tpu.dot_dimension_numbers<[1], [0], [0], [1], [0, 0, 1, 1], [], []>} : vector<256x128xbf16>, vector<128x128xbf16>, vector<256x128xf32> -> vector<256x128xf32>
    %7 = arith.addf %3, %6 : vector<256x128xf32>
    %c0_6 = arith.constant 0 : index
    %c0_7 = arith.constant 0 : index
    %8 = vector.load %arg7[%c0_6, %c0_7] : memref<256x128xf32, #tpu.memory_space<vmem>>, vector<256x128xf32>
    tpu.vector_store %arg7[%c0_6, %c0_7], %7 {strides = array<i32>} : memref<256x128xf32, #tpu.memory_space<vmem>>, vector<256x128xf32>,
    %c0_i32_8 = arith.constant 0 : i32
    %9 = arith.cmpi eq, %arg2, %c0_i32_8 : i32
    %10 = arith.extui %9 : i1 to i32
    %c0_i32_9 = arith.constant 0 : i32
    %11 = arith.cmpi ne, %10, %c0_i32_9 : i32
    scf.if %11 {
      %c0_10 = arith.constant 0 : index
      %c0_11 = arith.constant 0 : index
      %12 = vector.load %arg7[%c0_10, %c0_11] : memref<256x128xf32, #tpu.memory_space<vmem>>, vector<256x128xf32>
      %c0_12 = arith.constant 0 : index
      %c0_13 = arith.constant 0 : index
      %13 = vector.load %arg5[%c0_12, %c0_13] : memref<1x128xf32, #tpu.memory_space<vmem>>, vector<1x128xf32>
      %14 = vector.broadcast %13 : vector<1x128xf32> to vector<256x128xf32>
      %15 = arith.addf %12, %14 : vector<256x128xf32>
      %cst_14 = arith.constant 0.000000e+00 : f32
      %16 = vector.broadcast %cst_14 : f32 to vector<256x128xf32>
      %17 = arith.maximumf %15, %16 : vector<256x128xf32>
      %18 = arith.truncf %17 : vector<256x128xf32> to vector<256x128xbf16>
      %c0_15 = arith.constant 0 : index
      %c0_16 = arith.constant 0 : index
      %19 = vector.load %arg6[%c0_15, %c0_16] : memref<256x128xbf16, #tpu.memory_space<vmem>>, vector<256x128xbf16>
      tpu.vector_store %arg6[%c0_15, %c0_16], %18 {strides = array<i32>} : memref<256x128xbf16, #tpu.memory_space<vmem>>, vector<256x128xbf16>,
    } else {
    }
    return
  }
  func.func @transform_0(%arg0: i32, %arg1: i32, %arg2: i32) -> (i32, i32) {
    %c0_i32 = arith.constant 0 : i32
    return %arg0, %arg2 : i32, i32
  }
  func.func @transform_1(%arg0: i32, %arg1: i32, %arg2: i32) -> (i32, i32) {
    %c0_i32 = arith.constant 0 : i32
    return %arg2, %arg1 : i32, i32
  }
  func.func @transform_2(%arg0: i32, %arg1: i32, %arg2: i32) -> (i32, i32) {
    %c0_i32 = arith.constant 0 : i32
    %c0_i32_0 = arith.constant 0 : i32
    return %c0_i32, %arg1 : i32, i32
  }
  func.func @transform_3(%arg0: i32, %arg1: i32, %arg2: i32) -> (i32, i32) {
    %c0_i32 = arith.constant 0 : i32
    return %arg0, %arg1 : i32, i32
  }
}

</mosaic_0001>

<bundles_post_ra>
// kernel: tpu_custom_call.1
= control target key start
LH: loop header
LB: loop body
LE: loop exit
PB: predicated region body
PF: predicated region fallthrough
CT: control target
= control target key end

     0   :  { %s1712_s0 = inlined_call_operand.hbm [shape: bf16[2048,128], index: 0, kind: input, shape index: {}]   ;;  %s1713_s1 = inlined_call_operand.hbm [shape: bf16[128,128], index: 1, kind: input, shape index: {}]   ;;  %s1714_s2 = inlined_call_operand.vmem [shape: f32[1,128], index: 2, kind: input, shape index: {}]   ;;  %s1715_s3 = inlined_call_operand.hbm [shape: bf16[2048,128], index: 3, kind: output, shape index: {}]  }
   0x1   :  { %1717 = sst [smem:[#allocation12_spill]] %s1713_s1 }
   0x2   :  { %8 = vsyncpa [#allocation4], 0 }
   0x3   :  { %10 = vsyncpa [#allocation4 + $0x1], 0 }
   0x4   :  { %11 = vsyncpa [#allocation7], 0 }
   0x5   :  { %12 = vsyncpa [#allocation5], 0 }
   0x6   :  { %14 = vsyncpa [#allocation5 + $0x1], 0  ;;  %s1481_s12 = smov 0   ;;  %s1483_s13 = smov 0  }
   0x7   :  { %s1485_s14 = smov 0   ;;  %s1487_s15 = smov 0  }
   0x8   :  { %s1489_s16 = smov 0   ;;  %s1491_s17 = smov 0  }
   0x9 LB: > { %s971_s18 = sadd.s32 4294967295, %s1454_s17   ;;  %s972_s19 = sadd.s32 4294967294, %s1454_s17   ;;  %s1454_s17 = sphi %s1491_s17, %s20_s17   ;;  %s1450_s16 = sphi %s1489_s16, %s1731_s16   ;;  %s1446_s15 = sphi %s1487_s15, %s1730_s15   ;;  %s1442_s14 = sphi %s1485_s14, %s1729_s14   ;;  %s1438_s13 = sphi %s1483_s13, %s1728_s13   ;;  %s1434_s12 = sphi %s1481_s12, %s1727_s12  }
   0xa   : > { %p61_p0 = scmp.ne.s32.totalorder %s1438_s13, %s1434_s12  ;;  %p1515_p1 = scmp.eq.s32.totalorder %s971_s18, 0 }
   0xb   : > { %p1519_p2 = scmp.eq.s32.totalorder %s971_s18, 7  ;;  %p147_p3 = scmp.eq.s32.totalorder %s972_s19, 7 }
   0xc   : > { %p1525_p4 = por %p1515_p1, %p61_p0  ;;  %p973_p5 = scmp.ge.s32.totalorder %s1454_s17, 1 }
   0xd   : > { %p1530_p6 = por %p147_p3, %p61_p0  ;;  %p154_p7 = scmp.lt.s32.totalorder %s1454_s17, 9 }
   0xe   : > { %s1722_s1 = sld [smem:[#allocation12_spill]]  ;;  %s1456_s28 = smov [#allocation6]  }
   0xf   : > { %p1538_p8 = pnand %p973_p5, %p154_p7  ;;  %s171_s29 = sshll.u32 %s1456_s28, 4  ;;  %s172_s29 = int_to_ptr.vmem [resolvable:$true] %s171_s29 }
  0x10   : > { %s1716_s30 = smov 64   ;;  %s1458_s4 = smov 4  }
  0x11   : > { %p1238_p9 = pneg %p1538_p8  ;;  %s39_s5 = sadd.s32 1, %s1450_s16 }
  0x12   : > { %p41_p11 = scmp.ge.s32.totalorder %s39_s5, 8  ;;  %s48_s6 = sadd.s32 1, %s1442_s14 }
  0x13   : > { %p1239_p10 = pnand %p1238_p9, %p1515_p1  ;;  %p55_p12 = scmp.ne.s32.totalorder %s1442_s14, %s1438_s13 }
  0x14   : > { %s169_s26 = sshll.u32 %s1722_s1, 4  ;;  %p56_p13 = scmp.eq.s32.totalorder %s1454_s17, 0  ;;  %s170_s26 = int_to_ptr.hbm [resolvable:$true] %s169_s26 }
  0x15   : > { %1241 = dma.hbm_to_vmem [thread:$0]  (!%p1239_p10), %s170_s26, 1024, %s172_s29, [#allocation7], %s1716_s30, %s1716_s30, %s1458_s4  }
  0x16   : > { %s1733_s5 = smov (%p41_p11, %s39_s5), 0  ;;  %p1556_p0 = por %p56_p13, %p55_p12 }
  0x17   : > { %p1562_p3 = por %p1519_p2, %p55_p12  ;;  %s43_s9 = ssub.s32 %s1450_s16, %s1733_s5 }
  0x18   : > { %p1251_p5 = scmp.lt.s32.totalorder %s1454_s17, 8  ;;  %p46_p7 = scmp.eq.s32.totalorder %s43_s9, 0 }
  0x19   : > { %s191_s10 = sand.u32 1, %s1442_s14   ;;  %s1085_s19 = sshll.u32 %s1450_s16, 7 }
  0x1a   : > { %s977_s11 = sshll.u32 %s191_s10, 7  ;;  %s201_s26 = scalar_lea.hbm %s1712_s0, %s1085_s19 }
  0x1b   : > { %s1571_s18 = scalar_select %p46_p7, %s1442_s14, %s48_s6  }
  0x1c   : > { %s195_s28 = scalar_lea.vmem [#allocation3], %s977_s11  ;;  %s202_s21 = sshll.u32 %s201_s26, 4  ;;  %s203_s21 = int_to_ptr.hbm [resolvable:$true] %s202_s21 }
  0x1d   : > { %s204_s29 = sshll.u32 %s195_s28, 4  ;;  %p1243_p2 = pnand %p1251_p5, %p1556_p0  ;;  %s205_s29 = int_to_ptr.vmem [resolvable:$true] %s204_s29 }
  0x1e   : > { %s192_s30 = scalar_lea.sflag [#allocation4], %s191_s10  ;;  %s1726_s1 = smov 64  }
  0x1f   : > { %1245 = dma.hbm_to_vmem [thread:$0]  (!%p1243_p2), %s203_s21, 2048, %s205_s29, %s192_s30, %s1726_s1, %s1726_s1, %s1458_s4  }
  0x20   : > { %216 = sbr.rel (%p1538_p8) target bundleno = 272 (0x110), region = 32  ;;  %s1585_s6 = sand.u32 (!%p1538_p8), 1, %s1438_s13  }
  0x21   : > { %s981_s9 = sshll.u32 (!%p1538_p8), %s1585_s6, 7  ;;  %s219_s11 = scalar_lea.sflag (!%p1538_p8), [#allocation4], %s1585_s6 }
  0x22   : > { %s1591_s7 = scalar_lea.vmem (!%p1538_p8), [#allocation3], %s981_s9 }
  0x25   : > { %1421 = dma.done.wait (%p1525_p4), %s219_s11, 2048  }
  0x26   : > { %1423 = vsyncadd (%p1525_p4), %s219_s11, 4294965248 }
  0x27   : > { %1425 = dma.done.wait (%p1515_p1), [#allocation7], 1024  }
  0x28   : > { %1427 = vsyncadd (%p1515_p1), [#allocation7], 4294966272  ;;  %v1109_v0 = vld [vmem:[#allocation6 + $0x38] sm:$0xff]  ;;  %v1108_v1 = vld [vmem:[#allocation6 + $0x30] sm:$0xff]  ;;  %s1630_s22 = scalar_lea.vmem [#allocation8], %s981_s9  ;;  %s1110_s27 = sshll.u32 %s1446_s15, 7 }
  0x29   : > { %520 = vmatpush.bf16.msra.mxu0 %v1109_v0  ;;  %1206 = vmatpush.bf16.msra.mxu1 %v1109_v0  ;;  %v1107_v2 = vld [vmem:[#allocation6 + $0x28] sm:$0xff]  ;;  %v1106_v3 = vld [vmem:[#allocation6 + $0x20] sm:$0xff]  ;;  %v1105_v4 = vld [vmem:[#allocation6 + $0x18] sm:$0xff]  ;;  %s853_s10 = scalar_lea.hbm %s1715_s3, %s1110_s27  ;;  %s854_s15 = sshll.u32 %s1630_s22, 4  ;;  %s855_s15 = int_to_ptr.vmem [resolvable:$true] %s854_s15 }
  0x2a   : > { %1207 = vmatpush.bf16.msra.mxu2 %v1109_v0  ;;  %1208 = vmatpush.bf16.msra.mxu3 %v1109_v0  ;;  %v1104_v5 = vld [vmem:[#allocation6 + $0x10] sm:$0xff]  ;;  %v1103_v6 = vld [vmem:[#allocation6 + $0x8] sm:$0xff]  ;;  %v1102_v7 = vld [vmem:[#allocation6] sm:$0xff]  ;;  %s856_s19 = sshll.u32 %s853_s10, 4  ;;  %s841_s24 = scalar_lea.sflag [#allocation5], %s1585_s6  ;;  %s857_s19 = int_to_ptr.hbm [resolvable:$true] %s856_s19 }
  0x2b   : > { %v1086_v8 = vld [vmem:[%s1591_s7] sm:$0xff]  ;;  %v1087_v12 = vld [vmem:[%s1591_s7 + $0x8] sm:$0xff]  ;;  %v1088_v16 = vld [vmem:[%s1591_s7 + $0x10] sm:$0xff]  ;;  %s1382_s25 = sshra.s32 %s857_s19, 4  ;;  %s1388_s21 = scalar_lea.hbm %s1715_s3, 1024  ;;  %s1383_s25 = int_to_ptr.hbm [resolvable:$true] %s1382_s25 }
  0x2c   : > { %v1090_v9 = vld [vmem:[%s1591_s7 + $0x20] sm:$0xff]  ;;  %v1091_v13 = vld [vmem:[%s1591_s7 + $0x28] sm:$0xff]  ;;  %v1092_v17 = vld [vmem:[%s1591_s7 + $0x30] sm:$0xff]  ;;  %s1384_s26 = scalar_lea.hbm %s1383_s25, 128  ;;  %p1389_p9 = scmp.lt.s32.totalorder %s1383_s25, %s1715_s3 }
  0x2d   : > { %521 = vmatpush.bf16.msra.mxu0 %v1108_v1  ;;  %1209 = vmatpush.bf16.msra.mxu1 %v1108_v1  ;;  %v1094_v10 = vld [vmem:[%s1591_s7 + $0x40] sm:$0xff]  ;;  %v1095_v14 = vld [vmem:[%s1591_s7 + $0x48] sm:$0xff]  ;;  %v1096_v18 = vld [vmem:[%s1591_s7 + $0x50] sm:$0xff]  ;;  %p1385_p1 = scmp.ne.s32.totalorder %s1383_s25, %s1384_s26  ;;  %p1390_p10 = scmp.lt.s32.totalorder %s1388_s21, %s1384_s26 }
  0x2e   : > { %1210 = vmatpush.bf16.msra.mxu2 %v1108_v1  ;;  %1211 = vmatpush.bf16.msra.mxu3 %v1108_v1  ;;  %v1098_v11 = vld [vmem:[%s1591_s7 + $0x60] sm:$0xff]  ;;  %v1099_v15 = vld [vmem:[%s1591_s7 + $0x68] sm:$0xff]  ;;  %v1100_v19 = vld [vmem:[%s1591_s7 + $0x70] sm:$0xff] }
  0x2f   : > { %v1089_v20 = vld [vmem:[%s1591_s7 + $0x18] sm:$0xff]  ;;  %v1620_v26 = vld [vmem:[%s1714_s2] ss:$0 sm:$0xff]  ;;  %p1386_p4 = pnand %p1385_p1, %p1562_p3  ;;  %p1391_p11 = por %p1390_p10, %p1389_p9 }
  0x30   : > { %v1093_v21 = vld [vmem:[%s1591_s7 + $0x38] sm:$0xff] }
  0x31   : > { %522 = vmatpush.bf16.msra.mxu0 %v1107_v2  ;;  %1212 = vmatpush.bf16.msra.mxu1 %v1107_v2  ;;  %v1097_v22 = vld [vmem:[%s1591_s7 + $0x58] sm:$0xff]  ;;  %p1387_p8 = pneg %p1386_p4 }
  0x32   : > { %1213 = vmatpush.bf16.msra.mxu2 %v1107_v2  ;;  %1214 = vmatpush.bf16.msra.mxu3 %v1107_v2  ;;  %v1101_v23 = vld [vmem:[%s1591_s7 + $0x78] sm:$0xff] }
  0x33   : > { %p1392_p12 = pnand %p1391_p11, %p1387_p8 }
  0x35   : > { %523 = vmatpush.bf16.msra.mxu0 %v1106_v3  ;;  %1215 = vmatpush.bf16.msra.mxu1 %v1106_v3 }
  0x36   : > { %1216 = vmatpush.bf16.msra.mxu2 %v1106_v3  ;;  %1217 = vmatpush.bf16.msra.mxu3 %v1106_v3 }
  0x39   : > { %524 = vmatpush.bf16.msra.mxu0 %v1105_v4  ;;  %1218 = vmatpush.bf16.msra.mxu1 %v1105_v4 }
  0x3a   : > { %1219 = vmatpush.bf16.msra.mxu2 %v1105_v4  ;;  %1220 = vmatpush.bf16.msra.mxu3 %v1105_v4 }
  0x3d   : > { %525 = vmatpush.bf16.msra.mxu0 %v1104_v5  ;;  %1221 = vmatpush.bf16.msra.mxu1 %v1104_v5 }
  0x3e   : > { %1222 = vmatpush.bf16.msra.mxu2 %v1104_v5  ;;  %1223 = vmatpush.bf16.msra.mxu3 %v1104_v5 }
  0x41   : > { %526 = vmatpush.bf16.msra.mxu0 %v1103_v6  ;;  %1224 = vmatpush.bf16.msra.mxu1 %v1103_v6 }
  0x42   : > { %1225 = vmatpush.bf16.msra.mxu2 %v1103_v6  ;;  %1226 = vmatpush.bf16.msra.mxu3 %v1103_v6 }
  0x45   : > { %527 = vmatpush.bf16.msra.mxu0 %v1102_v7  ;;  %1227 = vmatpush.bf16.msra.mxu1 %v1102_v7 }
  0x46   : > { %1228 = vmatpush.bf16.msra.mxu2 %v1102_v7  ;;  %1229 = vmatpush.bf16.msra.mxu3 %v1102_v7 }
  0x48   : > { %528 = vmatmul.bf16.vlgmr.msra.gmra.mxu0 %v1086_v8  ;;  %548 = vmatmul.bf16.vlgmr.msra.gmra.mxu1 %v1090_v9 }
  0x49   : > { %568 = vmatmul.bf16.vlgmr.msra.gmra.mxu2 %v1094_v10  ;;  %588 = vmatmul.bf16.vlgmr.msra.gmra.mxu3 %v1098_v11 }
  0x58   : > { %533 = vmatmul.bf16.gmra.mxu0 %v1087_v12  ;;  %553 = vmatmul.bf16.gmra.mxu1 %v1091_v13 }
  0x59   : > { %573 = vmatmul.bf16.gmra.mxu2 %v1095_v14  ;;  %593 = vmatmul.bf16.gmra.mxu3 %v1099_v15 }
  0x68   : > { %538 = vmatmul.bf16.gmra.mxu0 %v1088_v16  ;;  %558 = vmatmul.bf16.gmra.mxu1 %v1092_v17 }
  0x69   : > { %578 = vmatmul.bf16.gmra.mxu2 %v1096_v18  ;;  %598 = vmatmul.bf16.gmra.mxu3 %v1100_v19 }
  0x78   : > { %543 = vmatmul.bf16.gmra.mxu0 %v1089_v20  ;;  %563 = vmatmul.bf16.gmra.mxu1 %v1093_v21 }
  0x79   : > { %583 = vmatmul.bf16.gmra.mxu2 %v1097_v22  ;;  %603 = vmatmul.bf16.gmra.mxu3 %v1101_v23 }
  0xc5   : > { %v529_v24 = vpop.f32.mrf.mxu0  ;;  %v549_v25 = vpop.f32.mrf.mxu1 }
  0xc6   : > { %v712_v27 = vadd.f32 %v1620_v26, %v529_v24  ;;  %v720_v28 = vadd.f32 %v1620_v26, %v549_v25 }
  0xc8   : > { %v744_v35 = vmax.f32 %v712_v27, 0.0  ;;  %v752_v36 = vmax.f32 %v720_v28, 0.0 }
  0xcc   : > { %v569_v29 = vpop.f32.mrf.mxu2  ;;  %v589_v30 = vpop.f32.mrf.mxu3 }
  0xcd   : > { %v531_v31 = vpop.f32.mrf.mxu0  ;;  %v551_v32 = vpop.f32.mrf.mxu1  ;;  %v728_v41 = vadd.f32 %v1620_v26, %v569_v29  ;;  %v736_v42 = vadd.f32 %v1620_v26, %v589_v30 }
  0xce   : > { %v713_v33 = vadd.f32 %v1620_v26, %v531_v31  ;;  %v721_v34 = vadd.f32 %v1620_v26, %v551_v32 }
  0xcf   : > { %v760_v49 = vmax.f32 %v728_v41, 0.0  ;;  %v768_v50 = vmax.f32 %v736_v42, 0.0 }
  0xd0   : > { %v745_v37 = vmax.f32 %v713_v33, 0.0  ;;  %v753_v38 = vmax.f32 %v721_v34, 0.0 }
  0xd2   : > { %v1114_v39 = vpack.c.bf16 %v745_v37, %v744_v35  ;;  %v1134_v40 = vpack.c.bf16 %v753_v38, %v752_v36 }
  0xd4   : > { %1115 = vst [vmem:[%s1630_s22] sm:$0xff] %v1114_v39   ;;  %v571_v43 = vpop.f32.mrf.mxu2  ;;  %v591_v44 = vpop.f32.mrf.mxu3 }
  0xd5   : > { %1194 = vst [vmem:[%s1630_s22 + $0x20] sm:$0xff] %v1134_v40   ;;  %v729_v45 = vadd.f32 %v1620_v26, %v571_v43  ;;  %v737_v46 = vadd.f32 %v1620_v26, %v591_v44  ;;  %v534_v47 = vpop.f32.mrf.mxu0  ;;  %v554_v48 = vpop.f32.mrf.mxu1 }
  0xd6   : > { %v714_v55 = vadd.f32 %v1620_v26, %v534_v47  ;;  %v722_v56 = vadd.f32 %v1620_v26, %v554_v48 }
  0xd7   : > { %v761_v51 = vmax.f32 %v729_v45, 0.0  ;;  %v769_v52 = vmax.f32 %v737_v46, 0.0 }
  0xd8   : > { %v746_v63 = vmax.f32 %v714_v55, 0.0  ;;  %v754_v0 = vmax.f32 %v722_v56, 0.0 }
  0xd9   : > { %v1154_v53 = vpack.c.bf16 %v761_v51, %v760_v49  ;;  %v1174_v54 = vpack.c.bf16 %v769_v52, %v768_v50 }
  0xdb   : > { %1198 = vst [vmem:[%s1630_s22 + $0x40] sm:$0xff] %v1154_v53  }
  0xdc   : > { %1202 = vst [vmem:[%s1630_s22 + $0x60] sm:$0xff] %v1174_v54   ;;  %v574_v57 = vpop.f32.mrf.mxu2  ;;  %v594_v58 = vpop.f32.mrf.mxu3 }
  0xdd   : > { %v536_v59 = vpop.f32.mrf.mxu0  ;;  %v556_v60 = vpop.f32.mrf.mxu1  ;;  %v730_v5 = vadd.f32 %v1620_v26, %v574_v57  ;;  %v738_v6 = vadd.f32 %v1620_v26, %v594_v58 }
  0xde   : > { %v715_v61 = vadd.f32 %v1620_v26, %v536_v59  ;;  %v723_v62 = vadd.f32 %v1620_v26, %v556_v60 }
  0xdf   : > { %v762_v13 = vmax.f32 %v730_v5, 0.0  ;;  %v770_v14 = vmax.f32 %v738_v6, 0.0 }
  0xe0   : > { %v747_v1 = vmax.f32 %v715_v61, 0.0  ;;  %v755_v2 = vmax.f32 %v723_v62, 0.0 }
  0xe2   : > { %v1119_v3 = vpack.c.bf16 %v747_v1, %v746_v63  ;;  %v1139_v4 = vpack.c.bf16 %v755_v2, %v754_v0 }
  0xe4   : > { %1191 = vst [vmem:[%s1630_s22 + $0x8] sm:$0xff] %v1119_v3   ;;  %v576_v7 = vpop.f32.mrf.mxu2  ;;  %v596_v8 = vpop.f32.mrf.mxu3 }
  0xe5   : > { %1195 = vst [vmem:[%s1630_s22 + $0x28] sm:$0xff] %v1139_v4   ;;  %v731_v9 = vadd.f32 %v1620_v26, %v576_v7  ;;  %v739_v10 = vadd.f32 %v1620_v26, %v596_v8  ;;  %v539_v11 = vpop.f32.mrf.mxu0  ;;  %v559_v12 = vpop.f32.mrf.mxu1 }
  0xe6   : > { %v716_v19 = vadd.f32 %v1620_v26, %v539_v11  ;;  %v724_v20 = vadd.f32 %v1620_v26, %v559_v12 }
  0xe7   : > { %v763_v15 = vmax.f32 %v731_v9, 0.0  ;;  %v771_v16 = vmax.f32 %v739_v10, 0.0 }
  0xe8   : > { %v748_v28 = vmax.f32 %v716_v19, 0.0  ;;  %v756_v29 = vmax.f32 %v724_v20, 0.0 }
  0xe9   : > { %v1159_v17 = vpack.c.bf16 %v763_v15, %v762_v13  ;;  %v1179_v18 = vpack.c.bf16 %v771_v16, %v770_v14 }
  0xeb   : > { %1199 = vst [vmem:[%s1630_s22 + $0x48] sm:$0xff] %v1159_v17  }
  0xec   : > { %1203 = vst [vmem:[%s1630_s22 + $0x68] sm:$0xff] %v1179_v18   ;;  %v579_v21 = vpop.f32.mrf.mxu2  ;;  %v599_v22 = vpop.f32.mrf.mxu3 }
  0xed   : > { %v541_v23 = vpop.f32.mrf.mxu0  ;;  %v561_v24 = vpop.f32.mrf.mxu1  ;;  %v732_v34 = vadd.f32 %v1620_v26, %v579_v21  ;;  %v740_v35 = vadd.f32 %v1620_v26, %v599_v22 }
  0xee   : > { %v717_v25 = vadd.f32 %v1620_v26, %v541_v23  ;;  %v725_v27 = vadd.f32 %v1620_v26, %v561_v24 }
  0xef   : > { %v764_v42 = vmax.f32 %v732_v34, 0.0  ;;  %v772_v43 = vmax.f32 %v740_v35, 0.0 }
  0xf0   : > { %v749_v30 = vmax.f32 %v717_v25, 0.0  ;;  %v757_v31 = vmax.f32 %v725_v27, 0.0 }
  0xf2   : > { %v1124_v32 = vpack.c.bf16 %v749_v30, %v748_v28  ;;  %v1144_v33 = vpack.c.bf16 %v757_v31, %v756_v29 }
  0xf4   : > { %1192 = vst [vmem:[%s1630_s22 + $0x10] sm:$0xff] %v1124_v32   ;;  %v581_v36 = vpop.f32.mrf.mxu2  ;;  %v601_v37 = vpop.f32.mrf.mxu3 }
  0xf5   : > { %1196 = vst [vmem:[%s1630_s22 + $0x30] sm:$0xff] %v1144_v33   ;;  %v733_v38 = vadd.f32 %v1620_v26, %v581_v36  ;;  %v741_v39 = vadd.f32 %v1620_v26, %v601_v37  ;;  %v544_v40 = vpop.f32.mrf.mxu0  ;;  %v564_v41 = vpop.f32.mrf.mxu1 }
  0xf6   : > { %v718_v48 = vadd.f32 %v1620_v26, %v544_v40  ;;  %v726_v49 = vadd.f32 %v1620_v26, %v564_v41 }
  0xf7   : > { %v765_v44 = vmax.f32 %v733_v38, 0.0  ;;  %v773_v45 = vmax.f32 %v741_v39, 0.0 }
  0xf8   : > { %v750_v56 = vmax.f32 %v718_v48, 0.0  ;;  %v758_v57 = vmax.f32 %v726_v49, 0.0 }
  0xf9   : > { %v1164_v46 = vpack.c.bf16 %v765_v44, %v764_v42  ;;  %v1184_v47 = vpack.c.bf16 %v773_v45, %v772_v43 }
  0xfb   : > { %1200 = vst [vmem:[%s1630_s22 + $0x50] sm:$0xff] %v1164_v46  }
  0xfc   : > { %1204 = vst [vmem:[%s1630_s22 + $0x70] sm:$0xff] %v1184_v47   ;;  %v584_v50 = vpop.f32.mrf.mxu2  ;;  %v604_v51 = vpop.f32.mrf.mxu3 }
  0xfd   : > { %v546_v52 = vpop.f32.mrf.mxu0  ;;  %v566_v53 = vpop.f32.mrf.mxu1  ;;  %v734_v62 = vadd.f32 %v1620_v26, %v584_v50  ;;  %v742_v63 = vadd.f32 %v1620_v26, %v604_v51 }
  0xfe   : > { %v719_v54 = vadd.f32 %v1620_v26, %v546_v52  ;;  %v727_v55 = vadd.f32 %v1620_v26, %v566_v53 }
  0xff   : > { %v766_v4 = vmax.f32 %v734_v62, 0.0  ;;  %v774_v5 = vmax.f32 %v742_v63, 0.0 }
 0x100   : > { %v751_v58 = vmax.f32 %v719_v54, 0.0  ;;  %v759_v59 = vmax.f32 %v727_v55, 0.0 }
 0x102   : > { %v1129_v60 = vpack.c.bf16 %v751_v58, %v750_v56  ;;  %v1149_v61 = vpack.c.bf16 %v759_v59, %v758_v57 }
 0x104   : > { %1193 = vst [vmem:[%s1630_s22 + $0x18] sm:$0xff] %v1129_v60   ;;  %v586_v0 = vpop.f32.mrf.mxu2  ;;  %v606_v1 = vpop.f32.mrf.mxu3 }
 0x105   : > { %1197 = vst [vmem:[%s1630_s22 + $0x38] sm:$0xff] %v1149_v61   ;;  %v735_v2 = vadd.f32 %v1620_v26, %v586_v0  ;;  %v743_v3 = vadd.f32 %v1620_v26, %v606_v1 }
 0x107   : > { %v767_v6 = vmax.f32 %v735_v2, 0.0  ;;  %v775_v7 = vmax.f32 %v743_v3, 0.0 }
 0x109   : > { %v1169_v8 = vpack.c.bf16 %v767_v6, %v766_v4  ;;  %v1189_v9 = vpack.c.bf16 %v775_v7, %v774_v5 }
 0x10b   : > { %1201 = vst [vmem:[%s1630_s22 + $0x58] sm:$0xff] %v1169_v8  }
 0x10c   : > { %1205 = vst [vmem:[%s1630_s22 + $0x78] sm:$0xff] %v1189_v9  }
 0x10d   : > { %1395 = shalt.err (!%p1392_p12)
}
 0x10e   : > { %s1459_s6 = smov 64   ;;  %s1460_s7 = smov 4  }
 0x10f   : > { %1236 = dma.vmem_to_hbm [thread:$0]  (%p1562_p3), %s855_s15, 2048, %s857_s19, %s841_s24, %s1459_s6, %s1459_s6, %s1460_s7  }
 0x110 PF: > { %p1253_p13 = scmp.ge.s32.totalorder %s1454_s17, 2  ;;  %s871_s1 = sand.u32 1, %s1434_s12  }
 0x111   : > { %s872_s20 = scalar_lea.sflag [#allocation5], %s871_s1 }
 0x112   : > { %p1247_p0 = pnand %p1253_p13, %p1530_p6 }
 0x114   : > { %p1248_p5 = pneg %p1247_p0 }
 0x116   : > { %1429 = dma.done.wait (%p1248_p5), %s872_s20, 2048  }
 0x117   : > { %1431 = vsyncadd (%p1248_p5), %s872_s20, 4294965248  ;;  %s20_s17 = sadd.s32 1, %s1454_s17   ;;  %s1727_s12 = smov %s1438_s13 }
 0x118   : > { %p17_p7 = scmp.ge.s32.totalorder %s20_s17, 10   ;;  %s1728_s13 = smov %s1442_s14 }
 0x119   : > { %s1729_s14 = smov %s1571_s18  ;;  %s1730_s15 = smov %s1450_s16 }
 0x11a   : > { %s1731_s16 = smov %s1733_s5  ;;  %19 = sbr.rel (!%p17_p7) target bundleno = 9 (0x9), region = 93 }
 0x11f   :  { %878 = vsyncpa [#allocation4], 1 }
 0x120   :  { %880 = vsyncpa [#allocation4 + $0x1], 1 }
 0x121   :  { %881 = vsyncpa [#allocation7], 1 }
 0x122   :  { %882 = vsyncpa [#allocation5], 1 }
 0x123   :  { %884 = vsyncpa [#allocation5 + $0x1], 1 }

</bundles_post_ra>
